<compile_context>
chip_gen: v7x
topology: tpu7x:2x2x1
jax: 0.10.0
libtpu: 0.0.40
codegen_flags: <defaults>
</compile_context>

<pallas_src>
import functools

import jax
import jax.numpy as jnp
from jax import lax
from jax.experimental import pallas as pl
from jax.experimental.pallas import tpu as pltpu


# -----------------------------------------------------------------------------
# Pallas kernel: stacked-tap conv + bias + ReLU + masked avg-pool + batched MLP.
# One batch tile (Bt images) per grid step.
# -----------------------------------------------------------------------------
def target_network_kernel(x_ref, cw_ref, cb_ref, w1_ref, b1_ref, w2_ref, b2_ref,
                          z_ref, *, k, wp, w_valid, lout, bt):
    """Refs (per grid step):
      x_ref  : (Bt, Cin, L)      bf16  zero-padded, spatially-flattened images
      cw_ref : (Cout, K*K*Cin)   f32   stacked conv taps
      cb_ref : (Cout, 1)         f32
      w1_ref : (Hd, Cout)        f32   already scaled by 1/(H*W)  (avg-pool folded in)
      b1_ref : (Hd, 1)           f32
      w2_ref : (Dout, Hd)        f32
      b2_ref : (Dout, 1)         f32
      z_ref  : (1, Dout, Bt)     f32   lane-dense output slab
    """
    cout = cb_ref.shape[0]

    # Validity mask for the "wide" (Wp-strided) conv output: column j is a real
    # pixel iff (j % Wp) < W.  Built in-kernel (iota + compare) -> no extra input.
    col = lax.broadcasted_iota(jnp.int32, (cout, lout), 1)
    valid = (col % wp) < w_valid

    pooled = []
    for b in range(bt):                                     # static unroll over batch tile
        x2d = x_ref[b].astype(jnp.float32)                  # (Cin, L)
        # Stack the K*K shifted tap views -> one (K*K*Cin, Lout) RHS, so the conv is a
        # single (Cout, K*K*Cin) @ (K*K*Cin, Lout) MXU op instead of 9 tiny dots.
        # Output column j = h*Wp + w; tap (kh,kw) reads flat index j + kh*Wp + kw,
        # i.e. padded pixel (h+kh, w+kw).  Columns with w >= W are junk, masked below.
        taps = jnp.concatenate(
            [x2d[:, kh * wp + kw: kh * wp + kw + lout]
             for kh in range(k) for kw in range(k)], axis=0)
        conv = jnp.dot(cw_ref[...], taps, preferred_element_type=jnp.float32)
        a = jnp.maximum(conv + cb_ref[...], 0.0)            # (Cout, Lout) f32
        # global average pool == masked lane reduction (1/(H*W) folded into w1)
        pooled.append(jnp.sum(jnp.where(valid, a, 0.0), axis=1, keepdims=True))
    y = pooled[0] if bt == 1 else jnp.concatenate(pooled, axis=1)   # (Cout, Bt)

    # Batched projector MLP: two matmuls per grid step, batch on the lane axis.
    h = jnp.maximum(
        jnp.dot(w1_ref[...], y, preferred_element_type=jnp.float32) + b1_ref[...],
        0.0)                                                        # (Hd, Bt)
    z = jnp.dot(w2_ref[...], h, preferred_element_type=jnp.float32) + b2_ref[...]
    z_ref[0] = z.astype(z_ref.dtype)                                # (Dout, Bt)


# -----------------------------------------------------------------------------
# Wrapper: layout glue (cast->pad->flatten, weight reshapes) + pallas_call
# -----------------------------------------------------------------------------
@jax.jit
def target_network_forward(x, params):
    """x: (B, Cin, H, W) float32 (NCHW, PyTorch convention). Returns (B, Dout)."""
    cw, cb, w1, b1, w2, b2 = (params["conv_w"], params["conv_b"],
                              params["w1"], params["b1"],
                              params["w2"], params["b2"])
    B, Cin, H, W = x.shape
    K = cw.shape[0]                                   # 3
    Cout = cw.shape[-1]
    Hd = w1.shape[-1]
    Dout = w2.shape[-1]

    p = K // 2
    Wp = W + (K - 1)                                  # padded width
    Lout = H * Wp                                     # wide conv-output length
    Hp = H + K                                        # H + 2p + 1 extra row covers all tap shifts
    L = Hp * Wp                                       # flat padded length

    # --- batch blocking: amortize the ~0.35 us per-grid-step overhead over Bt images.
    # Keep >= 2 grid steps when B >= 2 (v7x megacore sharding); cap the static unroll.
    BT_CAP = 32
    bt = 1 if B < 2 else max(1, min(BT_CAP, B // 2))
    steps = -(-B // bt)
    Bpad = steps * bt

    # --- glue: cast to bf16 FIRST, one merged pad (halo + extra zero row that doubles
    # as the flat tail padding), flatten spatial dims, pad batch to a multiple of Bt.
    xb = x.astype(jnp.bfloat16)
    xb = jnp.pad(xb, ((0, Bpad - B), (0, 0), (p, p + 1), (p, p)))   # (Bpad, Cin, Hp, Wp)
    x_flat = xb.reshape(Bpad, Cin, L)

    # conv weight as a single (Cout, K*K*Cin) slab matching the in-kernel tap stack
    # order (kh-major, then kw, then input channel); projector weights transposed so
    # the whole kernel runs in column orientation; avg-pool scale folded into w1.
    cw_stack = jnp.transpose(cw, (3, 0, 1, 2)).reshape(Cout, K * K * Cin)
    cw_stack = cw_stack.astype(jnp.float32)
    cb_col = cb.reshape(Cout, 1).astype(jnp.float32)
    w1_s = (w1.T * (1.0 / float(H * W))).astype(jnp.float32)        # (Hd, Cout)
    b1_col = b1.reshape(Hd, 1).astype(jnp.float32)
    w2_t = w2.T.astype(jnp.float32)                                  # (Dout, Hd)
    b2_col = b2.reshape(Dout, 1).astype(jnp.float32)

    kernel = functools.partial(target_network_kernel,
                               k=K, wp=Wp, w_valid=W, lout=Lout, bt=bt)

    def const_spec(shape):
        return pl.BlockSpec(shape, lambda g: (0, 0))      # resident across the grid

    # VMEM budget: double-buffered input tile + output tile + resident weights + headroom.
    in_block = bt * Cin * L * 2                           # bf16
    out_block = Dout * bt * 4
    resident = 4 * (cw_stack.size + cb_col.size + w1_s.size + b1_col.size
                    + w2_t.size + b2_col.size)
    vmem_limit = min(64 * 1024 * 1024,
                     8 * (2 * (in_block + out_block) + 2 * resident) + (4 << 20))

    z3 = pl.pallas_call(
        kernel,
        out_shape=jax.ShapeDtypeStruct((steps, Dout, bt), jnp.float32),
        grid=(steps,),
        in_specs=[
            pl.BlockSpec((bt, Cin, L), lambda g: (g, 0, 0)),   # per-step batch tile
            const_spec((Cout, K * K * Cin)),                   # stacked conv weight
            const_spec((Cout, 1)),                             # conv bias
            const_spec((Hd, Cout)),                            # w1^T * 1/(H*W)
            const_spec((Hd, 1)),                               # b1
            const_spec((Dout, Hd)),                            # w2^T
            const_spec((Dout, 1)),                             # b2
        ],
        out_specs=pl.BlockSpec((1, Dout, bt), lambda g: (g, 0, 0)),
        compiler_params=pltpu.CompilerParams(
            dimension_semantics=("parallel",),                 # megacore on v7x
            vmem_limit_bytes=int(vmem_limit)),
    )(x_flat, cw_stack, cb_col, w1_s, b1_col, w2_t, b2_col)

    # (steps, Dout, Bt) -> (Bpad, Dout) -> (B, Dout)
    z = jnp.transpose(z3, (0, 2, 1)).reshape(Bpad, Dout)
    return z[:B]


# -----------------------------------------------------------------------------
# Pure-JAX reference (mirrors the PyTorch forward semantics, full f32)
# -----------------------------------------------------------------------------
def reference_forward(x, params):
    cw, cb, w1, b1, w2, b2 = (params["conv_w"], params["conv_b"],
                              params["w1"], params["b1"],
                              params["w2"], params["b2"])
    out = lax.conv_general_dilated(
        x, cw, window_strides=(1, 1), padding="SAME",
        dimension_numbers=("NCHW", "HWIO", "NCHW"))
    out = jax.nn.relu(out + cb.reshape(1, -1, 1, 1))
    y = out.mean(axis=(2, 3))                      # encoder output (B, Cout)
    h = jax.nn.relu(y @ w1 + b1)
    return h @ w2 + b2                             # projector output (B, Dout)


# -----------------------------------------------------------------------------
def init_params(key, cin=4, cout=8, k=3, hidden=32, dout=16):
    ks = jax.random.split(key, 6)
    s = 0.1
    return {
        "conv_w": s * jax.random.normal(ks[0], (k, k, cin, cout), jnp.float32),
        "conv_b": s * jax.random.normal(ks[1], (cout,), jnp.float32),
        "w1":     s * jax.random.normal(ks[2], (cout, hidden), jnp.float32),
        "b1":     s * jax.random.normal(ks[3], (hidden,), jnp.float32),
        "w2":     s * jax.random.normal(ks[4], (hidden, dout), jnp.float32),
        "b2":     s * jax.random.normal(ks[5], (dout,), jnp.float32),
    }


if __name__ == "__main__":
    key = jax.random.PRNGKey(0)
    k_x, k_p = jax.random.split(key)

    B, Cin, H, W = 2, 4, 16, 16
    x = jax.random.normal(k_x, (B, Cin, H, W), jnp.float32)
    params = init_params(k_p, cin=Cin)

    z = target_network_forward(x, params)
    z = jax.block_until_ready(z)

    z_ref = jax.block_until_ready(reference_forward(x, params))
    assert z.shape == (B, 16)
    # bf16 image quantization (everything else is f32) -> comfortable tolerance.
    assert jnp.allclose(z, z_ref, atol=2e-2, rtol=2e-2), "mismatch vs reference"

    print("KERNEL_OK")
</pallas_src>

<mosaic_0001>
module attributes {stable_mosaic.version = 11 : i64} {
  func.func @target_network_kernel(%arg0: i32, %arg1: memref<1x4x342xbf16, #tpu.memory_space<vmem>>, %arg2: memref<8x36xf32, #tpu.memory_space<vmem>>, %arg3: memref<8x1xf32, #tpu.memory_space<vmem>>, %arg4: memref<32x8xf32, #tpu.memory_space<vmem>>, %arg5: memref<32x1xf32, #tpu.memory_space<vmem>>, %arg6: memref<16x32xf32, #tpu.memory_space<vmem>>, %arg7: memref<16x1xf32, #tpu.memory_space<vmem>>, %arg8: memref<1x16x1xf32, #tpu.memory_space<vmem>>) attributes {dimension_semantics = [#tpu.dimension_semantics<parallel>], iteration_bounds = array<i64: 2>, scalar_prefetch = 0 : i64, scratch_operands = 0 : i64, tpu.core_type = #tpu.core_type<tc>, window_params = [{transform_indices = @transform_0, window_bounds = array<i64: 1, 4, 342>}, {pipeline_mode = #tpu.pipeline_mode<synchronous>, transform_indices = @transform_1, window_bounds = array<i64: 8, 36>}, {pipeline_mode = #tpu.pipeline_mode<synchronous>, transform_indices = @transform_2, window_bounds = array<i64: 8, 1>}, {pipeline_mode = #tpu.pipeline_mode<synchronous>, transform_indices = @transform_3, window_bounds = array<i64: 32, 8>}, {pipeline_mode = #tpu.pipeline_mode<synchronous>, transform_indices = @transform_4, window_bounds = array<i64: 32, 1>}, {pipeline_mode = #tpu.pipeline_mode<synchronous>, transform_indices = @transform_5, window_bounds = array<i64: 16, 32>}, {pipeline_mode = #tpu.pipeline_mode<synchronous>, transform_indices = @transform_6, window_bounds = array<i64: 16, 1>}, {transform_indices = @transform_7, window_bounds = array<i64: 1, 16, 1>}]} {
    %0 = tpu.iota {dimensions = array<i32: 1>} : vector<8x288xi32>
    %c18_i32 = arith.constant 18 : i32
    %c0_i32 = arith.constant 0 : i32
    %1 = arith.cmpi eq, %c18_i32, %c0_i32 : i32
    %c1_i32 = arith.constant 1 : i32
    %2 = arith.select %1, %c1_i32, %c18_i32 : i32
    %3 = vector.broadcast %2 : i32 to vector<8x288xi32>
    %4 = arith.remsi %0, %3 : vector<8x288xi32>
    %c0_i32_0 = arith.constant 0 : i32
    %5 = vector.broadcast %c0_i32_0 : i32 to vector<8x288xi32>
    %6 = arith.cmpi ne, %4, %5 : vector<8x288xi32>
    %c0_i32_1 = arith.constant 0 : i32
    %7 = vector.broadcast %c0_i32_1 : i32 to vector<8x288xi32>
    %8 = arith.cmpi slt, %4, %7 : vector<8x288xi32>
    %c0_i32_2 = arith.constant 0 : i32
    %9 = arith.cmpi slt, %2, %c0_i32_2 : i32
    %10 = vector.broadcast %9 : i1 to vector<8x288xi1>
    %11 = vector.broadcast %10 : vector<8x288xi1> to vector<8x288xi1>
    %12 = arith.xori %8, %11 : vector<8x288xi1>
    %13 = arith.andi %12, %6 : vector<8x288xi1>
    %14 = vector.broadcast %2 : i32 to vector<8x288xi32>
    %15 = arith.addi %4, %14 : vector<8x288xi32>
    %16 = arith.select %13, %15, %4 : vector<8x288xi1>, vector<8x288xi32>
    %c16_i32 = arith.constant 16 : i32
    %17 = vector.broadcast %c16_i32 : i32 to vector<8x288xi32>
    %18 = arith.cmpi slt, %16, %17 : vector<8x288xi32>
    %c0 = arith.constant 0 : index
    %c0_3 = arith.constant 0 : index
    %c0_4 = arith.constant 0 : index
    %19 = vector.load %arg1[%c0, %c0_3, %c0_4] : memref<1x4x342xbf16, #tpu.memory_space<vmem>>, vector<1x4x342xbf16>
    %20 = vector.shape_cast %19 : vector<1x4x342xbf16> to vector<4x342xbf16>
    %21 = arith.extf %20 : vector<4x342xbf16> to vector<4x342xf32>
    %22 = vector.extract_strided_slice %21 {offsets = [0, 0], sizes = [4, 288], strides = [1, 1]} : vector<4x342xf32> to vector<4x288xf32>
    %23 = vector.extract_strided_slice %21 {offsets = [0, 1], sizes = [4, 288], strides = [1, 1]} : vector<4x342xf32> to vector<4x288xf32>
    %24 = vector.extract_strided_slice %21 {offsets = [0, 2], sizes = [4, 288], strides = [1, 1]} : vector<4x342xf32> to vector<4x288xf32>
    %25 = vector.extract_strided_slice %21 {offsets = [0, 18], sizes = [4, 288], strides = [1, 1]} : vector<4x342xf32> to vector<4x288xf32>
    %26 = vector.extract_strided_slice %21 {offsets = [0, 19], sizes = [4, 288], strides = [1, 1]} : vector<4x342xf32> to vector<4x288xf32>
    %27 = vector.extract_strided_slice %21 {offsets = [0, 20], sizes = [4, 288], strides = [1, 1]} : vector<4x342xf32> to vector<4x288xf32>
    %28 = vector.extract_strided_slice %21 {offsets = [0, 36], sizes = [4, 288], strides = [1, 1]} : vector<4x342xf32> to vector<4x288xf32>
    %29 = vector.extract_strided_slice %21 {offsets = [0, 37], sizes = [4, 288], strides = [1, 1]} : vector<4x342xf32> to vector<4x288xf32>
    %30 = vector.extract_strided_slice %21 {offsets = [0, 38], sizes = [4, 288], strides = [1, 1]} : vector<4x342xf32> to vector<4x288xf32>
    %31 = tpu.concatenate %22, %23, %24, %25, %26, %27, %28, %29, %30 in 0 : vector<4x288xf32>, vector<4x288xf32>, vector<4x288xf32>, vector<4x288xf32>, vector<4x288xf32>, vector<4x288xf32>, vector<4x288xf32>, vector<4x288xf32>, vector<4x288xf32> -> vector<36x288xf32>
    %c0_5 = arith.constant 0 : index
    %c0_6 = arith.constant 0 : index
    %32 = vector.load %arg2[%c0_5, %c0_6] : memref<8x36xf32, #tpu.memory_space<vmem>>, vector<8x36xf32>
    %cst = arith.constant dense<0.000000e+00> : vector<8x288xf32>
    %33 = tpu.matmul %32, %31, %cst {dimension_numbers = #tpu.dot_dimension_numbers<[1], [0], [0], [1], [0, 0, 1, 1], [], []>} : vector<8x36xf32>, vector<36x288xf32>, vector<8x288xf32> -> vector<8x288xf32>
    %c0_7 = arith.constant 0 : index
    %c0_8 = arith.constant 0 : index
    %34 = vector.load %arg3[%c0_7, %c0_8] : memref<8x1xf32, #tpu.memory_space<vmem>>, vector<8x1xf32>
    %35 = vector.broadcast %34 : vector<8x1xf32> to vector<8x288xf32>
    %36 = arith.addf %33, %35 : vector<8x288xf32>
    %cst_9 = arith.constant 0.000000e+00 : f32
    %37 = vector.broadcast %cst_9 : f32 to vector<8x288xf32>
    %38 = arith.maximumf %36, %37 : vector<8x288xf32>
    %cst_10 = arith.constant 0.000000e+00 : f32
    %39 = vector.broadcast %cst_10 : f32 to vector<8x288xf32>
    %40 = arith.select %18, %38, %39 : vector<8x288xi1>, vector<8x288xf32>
    %cst_11 = arith.constant dense<0.000000e+00> : vector<8xf32>
    %41 = vector.multi_reduction <add>, %40, %cst_11 [1] : vector<8x288xf32> to vector<8xf32>
    %42 = vector.shape_cast %41 : vector<8xf32> to vector<8x1xf32>
    %c0_12 = arith.constant 0 : index
    %c0_13 = arith.constant 0 : index
    %43 = vector.load %arg4[%c0_12, %c0_13] : memref<32x8xf32, #tpu.memory_space<vmem>>, vector<32x8xf32>
    %cst_14 = arith.constant dense<0.000000e+00> : vector<32x1xf32>
    %44 = tpu.matmul %43, %42, %cst_14 {dimension_numbers = #tpu.dot_dimension_numbers<[1], [0], [0], [1], [0, 0, 1, 1], [], []>} : vector<32x8xf32>, vector<8x1xf32>, vector<32x1xf32> -> vector<32x1xf32>
    %c0_15 = arith.constant 0 : index
    %c0_16 = arith.constant 0 : index
    %45 = vector.load %arg5[%c0_15, %c0_16] : memref<32x1xf32, #tpu.memory_space<vmem>>, vector<32x1xf32>
    %46 = arith.addf %44, %45 : vector<32x1xf32>
    %cst_17 = arith.constant 0.000000e+00 : f32
    %47 = vector.broadcast %cst_17 : f32 to vector<32x1xf32>
    %48 = arith.maximumf %46, %47 : vector<32x1xf32>
    %c0_18 = arith.constant 0 : index
    %c0_19 = arith.constant 0 : index
    %49 = vector.load %arg6[%c0_18, %c0_19] : memref<16x32xf32, #tpu.memory_space<vmem>>, vector<16x32xf32>
    %cst_20 = arith.constant dense<0.000000e+00> : vector<16x1xf32>
    %50 = tpu.matmul %49, %48, %cst_20 {dimension_numbers = #tpu.dot_dimension_numbers<[1], [0], [0], [1], [0, 0, 1, 1], [], []>} : vector<16x32xf32>, vector<32x1xf32>, vector<16x1xf32> -> vector<16x1xf32>
    %c0_21 = arith.constant 0 : index
    %c0_22 = arith.constant 0 : index
    %51 = vector.load %arg7[%c0_21, %c0_22] : memref<16x1xf32, #tpu.memory_space<vmem>>, vector<16x1xf32>
    %52 = arith.addf %50, %51 : vector<16x1xf32>
    %c0_23 = arith.constant 0 : index
    %c0_24 = arith.constant 0 : index
    %c0_25 = arith.constant 0 : index
    %53 = vector.load %arg8[%c0_23, %c0_24, %c0_25] : memref<1x16x1xf32, #tpu.memory_space<vmem>>, vector<1x16x1xf32>
    %54 = vector.shape_cast %53 : vector<1x16x1xf32> to vector<16x1xf32>
    %55 = vector.shape_cast %52 : vector<16x1xf32> to vector<1x16x1xf32>
    tpu.vector_store %arg8[%c0_23, %c0_24, %c0_25], %55 {strides = array<i32>} : memref<1x16x1xf32, #tpu.memory_space<vmem>>, vector<1x16x1xf32>,
    return
  }
  func.func @transform_0(%arg0: i32) -> (i32, i32, i32) {
    %c0_i32 = arith.constant 0 : i32
    %c0_i32_0 = arith.constant 0 : i32
    %c0_i32_1 = arith.constant 0 : i32
    return %arg0, %c0_i32, %c0_i32_0 : i32, i32, i32
  }
  func.func @transform_1(%arg0: i32) -> (i32, i32) {
    %c0_i32 = arith.constant 0 : i32
    %c0_i32_0 = arith.constant 0 : i32
    %c0_i32_1 = arith.constant 0 : i32
    return %c0_i32, %c0_i32_0 : i32, i32
  }
  func.func @transform_2(%arg0: i32) -> (i32, i32) {
    %c0_i32 = arith.constant 0 : i32
    %c0_i32_0 = arith.constant 0 : i32
    %c0_i32_1 = arith.constant 0 : i32
    return %c0_i32, %c0_i32_0 : i32, i32
  }
  func.func @transform_3(%arg0: i32) -> (i32, i32) {
    %c0_i32 = arith.constant 0 : i32
    %c0_i32_0 = arith.constant 0 : i32
    %c0_i32_1 = arith.constant 0 : i32
    return %c0_i32, %c0_i32_0 : i32, i32
  }
  func.func @transform_4(%arg0: i32) -> (i32, i32) {
    %c0_i32 = arith.constant 0 : i32
    %c0_i32_0 = arith.constant 0 : i32
    %c0_i32_1 = arith.constant 0 : i32
    return %c0_i32, %c0_i32_0 : i32, i32
  }
  func.func @transform_5(%arg0: i32) -> (i32, i32) {
    %c0_i32 = arith.constant 0 : i32
    %c0_i32_0 = arith.constant 0 : i32
    %c0_i32_1 = arith.constant 0 : i32
    return %c0_i32, %c0_i32_0 : i32, i32
  }
  func.func @transform_6(%arg0: i32) -> (i32, i32) {
    %c0_i32 = arith.constant 0 : i32
    %c0_i32_0 = arith.constant 0 : i32
    %c0_i32_1 = arith.constant 0 : i32
    return %c0_i32, %c0_i32_0 : i32, i32
  }
  func.func @transform_7(%arg0: i32) -> (i32, i32, i32) {
    %c0_i32 = arith.constant 0 : i32
    %c0_i32_0 = arith.constant 0 : i32
    %c0_i32_1 = arith.constant 0 : i32
    return %arg0, %c0_i32, %c0_i32_0 : i32, i32, i32
  }
}

</mosaic_0001>

<bundles_post_ra>
// kernel: target_network_forward.1
= control target key start
LH: loop header
LB: loop body
LE: loop exit
PB: predicated region body
PF: predicated region fallthrough
CT: control target
= control target key end

     0   :  { %s1093_s24 = smov 0   ;;  %s1213_s0 = inlined_call_operand.vmem [shape: bf16[2,4,342], index: 0, kind: input, shape index: {}]   ;;  %s1214_s1 = inlined_call_operand.vmem [shape: f32[8,36], index: 1, kind: input, shape index: {}]   ;;  %s1215_s2 = inlined_call_operand.vmem [shape: f32[8,1], index: 2, kind: input, shape index: {}]   ;;  %s1216_s3 = inlined_call_operand.vmem [shape: f32[32,8], index: 3, kind: input, shape index: {}]   ;;  %s1217_s4 = inlined_call_operand.vmem [shape: f32[32,1], index: 4, kind: input, shape index: {}]   ;;  %s1218_s5 = inlined_call_operand.vmem [shape: f32[16,32], index: 5, kind: input, shape index: {}]   ;;  %s1219_s6 = inlined_call_operand.vmem [shape: f32[16,1], index: 6, kind: input, shape index: {}]   ;;  %s1220_s7 = inlined_call_operand.vmem [shape: f32[2,16,1], index: 7, kind: output, shape index: {}]  }
   0x1 LB: > { %s872_s25 = sadd.s32 4294967295, %s1039_s24   ;;  %p876_p0 = scmp.ge.s32.totalorder %s1039_s24, 1  ;;  %s1039_s24 = sphi %s1093_s24, %s17_s24  }
   0x2   : > { %p237_p1 = scmp.lt.s32.totalorder %s1039_s24, 3 }
   0x4   : > { %p238_p2 = pnand %p876_p0, %p237_p1 }
   0x5   : > { %p269_p3 = scmp.lt.s32.totalorder (!%p238_p2), %s872_s25, 1  ;;  %v1041_v3 = vmov (!%p238_p2), 0.0|0.0   ;;  %s1042_s30 = smov (!%p238_p2), 126   ;;  %v1049_v9 = vmov (!%p238_p2), 0.0   ;;  %vm1050_vm0 = vmmov (!%p238_p2), 0   ;;  %v1051_v10 = vmov (!%p238_p2), 0  }
   0x6   : > { %241 = sbr.rel (%p238_p2) target bundleno = 981 (0x3d5), region = 48  ;;  %951 = vmatprep.subr.bf16.mxu1 (!%p238_p2), %v1041_v3  ;;  %s1043_s8 = smov (!%p238_p2), 110   ;;  %530 = vmatprep.mubr.f32.mxu0 (!%p238_p2), %v1049_v9  ;;  %v450_v11 = vld [vmem:[%s1215_s2] sm:$0xff] (!%p238_p2)  ;;  %vm349_vm1 = vcmask (!%p238_p2), 1039360   ;;  %vm436_vm2 = vcmask (!%p238_p2), 1043456   ;;  %vm373_vm3 = vcmask (!%p238_p2), 900096  }
   0x7   : > { %s1044_s9 = smov (!%p238_p2), 127   ;;  %s1045_s10 = smov (!%p238_p2), 109   ;;  %921 = vmatprep.mubr.msk.f32.mxu1 (!%p238_p2), %vm1050_vm0, %v1049_v9  ;;  %1032 = vset.pattern.permute.xlu0 (!%p238_p2), %v1051_v10  ;;  %vm361_vm4 = vcmask (!%p238_p2), 1031168   ;;  %vm385_vm5 = vcmask (!%p238_p2), 891904   ;;  %vm397_vm6 = vcmask (!%p238_p2), 883712   ;;  %vm409_vm7 = vcmask (!%p238_p2), 752640  }
   0x8   : > { %s1046_s11 = smov (!%p238_p2), 108   ;;  %s1047_s12 = smov (!%p238_p2), 92   ;;  %vm421_vm8 = vcmask (!%p238_p2), 744448   ;;  %vm433_vm9 = vcmask (!%p238_p2), 736256   ;;  %vm456_vm10 = vcmask (!%p238_p2), 293888  }
   0x9   : > { %s1048_s13 = smov (!%p238_p2), 91   ;;  %s1052_s14 = smov (!%p238_p2), 90  }
   0xd   : > { %s1222_s25 = smov (!%p269_p3, %s872_s25), 1 }
   0xe   : > { %s965_s26 = smul.u32 6, %s1222_s25  ;;  %s893_s18 = sshll.u32 %s1222_s25, 4 }
   0xf   : > { %s278_s27 = scalar_lea.vmem %s1220_s7, %s893_s18 }
  0x10   : > { %s273_s29 = scalar_lea.vmem %s1213_s0, %s965_s26 }
  0x11   : > { %v334_v0 = vld [vmem:[%s273_s29] sm:$0x3f] }
  0x12   : > { %v1107_v1 = vunpack.c.l.bf16 %v334_v0  ;;  %v336_v2 = vunpack.c.h.bf16 %v334_v0 }
  0x14   : > { %355 = vrot.lane.b32.xlu0 %v1107_v1, %s1042_s30  ;;  %v342_v4 = vcombine.low %v336_v2, %v336_v2  ;;  %v339_v5 = vcombine.high %v1107_v1, %v1107_v1  ;;  %v341_v7 = vcombine.low %v1107_v1, %v1107_v1 }
  0x16   : > { %v1002_v6 = vpack.i.bf16 %v342_v4, %v1107_v1  ;;  %v997_v8 = vpack.i.bf16 %v336_v2, %v339_v5 }
  0x18   : > { %1003 = vrot.lane.b32.xlu1 %v1002_v6, %s1043_s8  ;;  %993 = vrot.lane.b32.xlu0 %v1002_v6, %s1044_s9 }
  0x1c   : > { %343 = vrot.lane.b32.xlu1 %v341_v7, %s1044_s9  ;;  %998 = vrot.lane.b32.xlu0 %v997_v8, %s1042_s30 }
  0x20   : > { %367 = vrot.lane.b32.xlu1 %v341_v7, %s1043_s8  ;;  %1008 = vrot.lane.b32.xlu0 %v997_v8, %s1045_s10 }
  0x24   : > { %1013 = vrot.lane.b32.xlu1 %v1002_v6, %s1046_s11  ;;  %1018 = vrot.lane.b32.xlu0 %v997_v8, %s1047_s12 }
  0x28   : > { %1023 = vrot.lane.b32.xlu1 %v1002_v6, %s1048_s13  ;;  %379 = vrot.lane.b32.xlu0 %v1107_v1, %s1045_s10 }
  0x2c   : > { %391 = vrot.lane.b32.xlu1 %v341_v7, %s1046_s11  ;;  %403 = vrot.lane.b32.xlu0 %v1107_v1, %s1047_s12 }
  0x30   : > { %415 = vrot.lane.b32.xlu1 %v341_v7, %s1048_s13  ;;  %1028 = vrot.lane.b32.xlu0 %v997_v8, %s1052_s14  ;;  %v449_v8 = vld [vmem:[%s1214_s1] sm:$0xff] }
  0x34   : > { %427 = vrot.lane.b32.xlu1 %v1107_v1, %s1052_s14  ;;  %453 = vperm.xlu0 %1032, %v450_v11  }
  0x86   : > { %v356_v12 = vpop.permute.xlu0 %355 }
  0x8a   : > { %v1004_v13 = vpop.permute.xlu1 %1003  ;;  %v994_v14 = vpop.permute.xlu0 %993 }
  0x8b   : > { %v996_v15 = vunpack.i.h.bf16 %v994_v14  ;;  %v995_v16 = vunpack.i.l.bf16 %v994_v14  ;;  %v1006_v17 = vunpack.i.h.bf16 %v1004_v13  ;;  %v1005_v18 = vunpack.i.l.bf16 %v1004_v13 }
  0x8d   : > { %v351_v19 = vsel %vm349_vm1, %v995_v16, %v996_v15  ;;  %v439_v24 = vsel %vm436_vm2, %v336_v2, %v996_v15  ;;  %v375_v29 = vsel %vm373_vm3, %v1005_v18, %v1006_v17  ;;  %v279_v15 = vlaneseq }
  0x8e   : > { %v344_v20 = vpop.permute.xlu1 %343  ;;  %v999_v21 = vpop.permute.xlu0 %998  ;;  %v438_v25 = vsel %vm436_vm2, %v339_v5, %v351_v19 }
  0x8f   : > { %v1001_v22 = vunpack.i.h.bf16 %v999_v21  ;;  %v1000_v23 = vunpack.i.l.bf16 %v999_v21  ;;  %v350_v26 = vsel %vm349_vm1, %v344_v20, %v995_v16  ;;  %v280_v16 = vand.u32 127, %v279_v15 }
  0x90   : > { %v437_v37 = vsel %vm436_vm2, %v1107_v1, %v350_v26 }
  0x91   : > { %v442_v27 = vsel %vm436_vm2, %v1001_v22, %v1006_v17  ;;  %v363_v28 = vsel %vm361_vm4, %v1000_v23, %v1001_v22  ;;  %v362_v36 = vsel %vm361_vm4, %v356_v12, %v1000_v23  ;;  %v282_v17 = vadd.s32 256, %v280_v16 }
  0x92   : > { %v368_v30 = vpop.permute.xlu1 %367  ;;  %v1009_v31 = vpop.permute.xlu0 %1008  ;;  %v952_v32 = vpack.c.bf16 %v442_v27, %v439_v24  ;;  %v441_v33 = vsel %vm436_vm2, %v363_v28, %v375_v29  ;;  %v1158_v21 = vmul.u32.u64.low 3817748708, %v280_v16  ;;  %v1159_v22 = vmul.u32.u64.high 3817748708, %v280_v16, %v1158_v21 }
  0x93   : > { %v374_v34 = vsel %vm373_vm3, %v368_v30, %v1005_v18  ;;  %v943_v35 = vpack.c.bf16 %v441_v33, %v438_v25  ;;  %v1011_v40 = vunpack.i.h.bf16 %v1009_v31  ;;  %v1010_v41 = vunpack.i.l.bf16 %v1009_v31 }
  0x94   : > { %953 = vmatpush3.bf16.msra.mxu1 %v952_v32  ;;  %v440_v38 = vsel %vm436_vm2, %v362_v36, %v374_v34  ;;  %v281_v18 = vadd.s32 128, %v280_v16  ;;  %v1155_v19 = vmul.u32.u64.low 3817748708, %v282_v17  ;;  %v1156_v20 = vmul.u32.u64.high 3817748708, %v282_v17, %v1155_v19 }
  0x95   : > { %944 = vmatprep.subr.bf16.mxu0 %v943_v35  ;;  %v945_v39 = vpack.c.bf16 %v440_v38, %v437_v37  ;;  %954 = vmatprep.subr.bf16.mxu1 %v1041_v3  ;;  %v387_v50 = vsel %vm385_vm5, %v1010_v41, %v1011_v40  ;;  %v289_v26 = vshrl.u32 %v1159_v22, 4  ;;  %v731_v19 = vld [vmem:[%s1219_s6] sm:$0xff] }
  0x96   : > { %v1014_v42 = vpop.permute.xlu1 %1013  ;;  %v1019_v43 = vpop.permute.xlu0 %1018  ;;  %v1161_v23 = vmul.u32.u64.low 3817748708, %v281_v18  ;;  %v1162_v24 = vmul.u32.u64.high 3817748708, %v281_v18, %v1161_v23  ;;  %v311_v25 = vshrl.u32 %v1156_v20, 4 }
  0x97   : > { %v1016_v44 = vunpack.i.h.bf16 %v1014_v42  ;;  %v1015_v45 = vunpack.i.l.bf16 %v1014_v42  ;;  %v1021_v46 = vunpack.i.h.bf16 %v1019_v43  ;;  %v1020_v47 = vunpack.i.l.bf16 %v1019_v43  ;;  %946 = vmatpush1.bf16.msra.mxu0 %v945_v39 }
  0x98   : > { %v300_v27 = vshrl.u32 %v1162_v24, 4  ;;  %v312_v28 = vmul.u32 18, %v311_v25  ;;  %v290_v29 = vmul.u32 18, %v289_v26 }
  0x99   : > { %v399_v53 = vsel %vm397_vm6, %v1015_v45, %v1016_v44  ;;  %v411_v54 = vsel %vm409_vm7, %v1020_v47, %v1021_v46  ;;  %v445_v56 = vsel %vm436_vm2, %v1011_v40, %v1016_v44 }
  0x9a   : > { %v1024_v48 = vpop.permute.xlu1 %1023  ;;  %v380_v49 = vpop.permute.xlu0 %379  ;;  %v444_v61 = vsel %vm436_vm2, %v387_v50, %v399_v53  ;;  %v301_v30 = vmul.u32 18, %v300_v27  ;;  %v313_v31 = vsub.s32 %v282_v17, %v312_v28  ;;  %v291_v32 = vsub.s32 %v280_v16, %v290_v29  ;;  %v730_v17 = vld [vmem:[%s1218_s5 + $0x8] sm:$0xff] }
  0x9b   : > { %v1026_v51 = vunpack.i.h.bf16 %v1024_v48  ;;  %v1025_v52 = vunpack.i.l.bf16 %v1024_v48  ;;  %v386_v1 = vsel %vm385_vm5, %v380_v49, %v1010_v41 }
  0x9c   : > { %v302_v33 = vsub.s32 %v281_v18, %v301_v30  ;;  %vm318_vm11 = vcmp.ne.s32.totalorder %v313_v31, 0  ;;  %vm321_vm12 = vcmp.lt.s32.totalorder %v313_v31, 0  ;;  %vm316_vm13 = vcmp.ne.s32.totalorder %v291_v32, 0  ;;  %v732_v18 = vld [vmem:[%s1219_s6 + $0x8] sm:$0xff] }
  0x9d   : > { %v423_v55 = vsel %vm421_vm8, %v1025_v52, %v1026_v51  ;;  %v448_v57 = vsel %vm436_vm2, %v1021_v46, %v1026_v51  ;;  %vm319_vm14 = vcmp.lt.s32.totalorder %v291_v32, 0  ;;  %v327_v35 = vadd.s32 18, %v313_v31  ;;  %vm324_vm1 = vmand %vm321_vm12, %vm318_vm11 }
  0x9e   : > { %v392_v58 = vpop.permute.xlu1 %391  ;;  %v404_v59 = vpop.permute.xlu0 %403  ;;  %v955_v60 = vpack.c.bf16 %v448_v57, %v445_v56  ;;  %v447_v62 = vsel %vm436_vm2, %v411_v54, %v423_v55  ;;  %vm317_vm15 = vcmp.ne.s32.totalorder %v302_v33, 0  ;;  %vm320_vm0 = vcmp.lt.s32.totalorder %v302_v33, 0  ;;  %v619_v57 = vld [vmem:[%s1216_s3] sm:$0xff] }
  0x9f   : > { %v947_v63 = vpack.c.bf16 %v447_v62, %v444_v61  ;;  %v398_v0 = vsel %vm397_vm6, %v392_v58, %v1015_v45  ;;  %v410_v4 = vsel %vm409_vm7, %v404_v59, %v1020_v47  ;;  %v325_v37 = vadd.s32 18, %v291_v32  ;;  %vm323_vm3 = vmand %vm320_vm0, %vm317_vm15  ;;  %v620_v59 = vld [vmem:[%s1216_s3 + $0x8] sm:$0xff]  ;;  %v622_v61 = vld [vmem:[%s1216_s3 + $0x18] sm:$0xff] }
  0xa0   : > { %956 = vmatpush3.bf16.msra.mxu1 %v955_v60  ;;  %v443_v10 = vsel %vm436_vm2, %v386_v1, %v398_v0  ;;  %v326_v40 = vadd.s32 18, %v302_v33  ;;  %v330_v41 = vsel %vm324_vm1, %v327_v35, %v313_v31  ;;  %vm614_vm7 = vcmask 261120   ;;  %v621_v60 = vld [vmem:[%s1216_s3 + $0x10] sm:$0xff]  ;;  %v729_v62 = vld [vmem:[%s1218_s5] sm:$0xff] }
  0xa1   : > { %948 = vmatprep.subr.bf16.mxu0 %v947_v63  ;;  %919 = vmatprep.subr.mxu1 %v1049_v9  ;;  %vm333_vm4 = vcmp.lt.s32.totalorder %v330_v41, 16  ;;  %v624_v63 = vld [vmem:[%s1217_s4 + $0x8] sm:$0xff]  ;;  %v623_v0 = vld [vmem:[%s1217_s4] sm:$0xff] }
  0xa2   : > { %v416_v2 = vpop.permute.xlu1 %415  ;;  %v1029_v3 = vpop.permute.xlu0 %1028  ;;  %v329_v45 = vsel %vm323_vm3, %v326_v40, %v302_v33 }
  0xa3   : > { %v422_v5 = vsel %vm421_vm8, %v416_v2, %v1025_v52  ;;  %v1031_v6 = vunpack.i.h.bf16 %v1029_v3  ;;  %v1030_v7 = vunpack.i.l.bf16 %v1029_v3  ;;  %vm332_vm6 = vcmp.lt.s32.totalorder %v329_v45, 16 }
  0xa4   : > { %v446_v9 = vsel %vm436_vm2, %v410_v4, %v422_v5  ;;  %vm627_vm8 = vcmask 64512   ;;  %v626_v5 = vld [vmem:[%s1217_s4 + $0x18] sm:$0xff] }
  0xa5   : > { %v949_v11 = vpack.c.bf16 %v446_v9, %v443_v10  ;;  %920 = vmatpush3.msk.msra.mxu1 %vm436_vm2, %v1031_v6  ;;  %v435_v12 = vsel %vm433_vm9, %v1030_v7, %v1031_v6 }
  0xa6   : > { %v428_v13 = vpop.permute.xlu1 %427  ;;  %922 = vmatmul.mubr.msk.f32.vlgmr.msra.gmra.mrb[0].mxu1 %vm456_vm10, %v449_v8 }
  0xa7   : > { %950 = vmatpush1.bf16.msra.mxu0 %v949_v11  ;;  %v434_v14 = vsel %vm433_vm9, %v428_v13, %v1030_v7  ;;  %940 = vmatprep.mubr.msk.f32.mxu1 %vm614_vm7, %v729_v62  ;;  %v625_v7 = vld [vmem:[%s1217_s4 + $0x10] sm:$0xff]  ;;  %vm814_vm9 = vcmask 7168  }
  0xa8   : > { %880 = vmatprep.subr.msk.mxu0 %vm436_vm2, %v435_v12 }
  0xab   : > { %881 = vmatpush1.msk.msra.mxu0 %vm436_vm2, %v434_v14  ;;  %vm322_vm2 = vmand %vm319_vm14, %vm316_vm13 }
  0xac   : > { %882 = vmatmul.mubr.msk.f32.vlgmr.msra.gmra.mrb[0].mxu0 %vm456_vm10, %v449_v8  ;;  %v328_v42 = vsel %vm322_vm2, %v325_v37, %v291_v32 }
  0xad   : > { %vm331_vm5 = vcmp.lt.s32.totalorder %v328_v42, 16  ;;  %926 = vmatprep.mubr.msk.f32.mxu0 %vm627_vm8, %v619_v57 }
  0xb3   : > { %v454_v34 = vpop.permute.xlu0 %453 }
 0x179   : > { %v603_v36 = vpop.f32.mrb[0].mxu1 }
 0x17a   : > { %v604_v38 = vadd.f32 %v603_v36, %v454_v34  ;;  %v923_v39 = vpop.f32.mrb[1].mxu1 }
 0x17c   : > { %v609_v43 = vmax.f32 %v604_v38, 0.0 }
 0x17e   : > { %v612_v50 = vsel %vm333_vm4, %v609_v43, 0.0 }
 0x17f   : > { %v532_v44 = vpop.f32.mrb[0].mxu0  ;;  %v615_v54 = vsel %vm614_vm7, %v612_v50, 0.0 }
 0x180   : > { %v533_v46 = vadd.f32 %v532_v44, %v454_v34  ;;  %v534_v47 = vpop.f32.mrb[1].mxu0 }
 0x181   : > { %v535_v48 = vadd.f32 %v534_v47, %v454_v34 }
 0x182   : > { %v607_v49 = vmax.f32 %v533_v46, 0.0 }
 0x183   : > { %v608_v51 = vmax.f32 %v535_v48, 0.0 }
 0x184   : > { %v610_v52 = vsel %vm331_vm5, %v607_v49, 0.0 }
 0x185   : > { %v611_v53 = vsel %vm332_vm6, %v608_v51, 0.0 }
 0x186   : > { %v613_v55 = vadd.f32 %v611_v53, %v610_v52 }
 0x188   : > { %v616_v56 = vadd.f32 %v615_v54, %v613_v55 }
 0x18a   : > { %617 = vadd.xlane.f32.xlu1 %v616_v56 }
 0x217   : > { %v618_v58 = vpop.xlane.xlu1 %617 }
 0x218   : > { %924 = vmatprep.subr.mxu0 %v618_v58 }
 0x219   : > { %925 = vmatpush3.msra.mxu0 %v618_v58 }
 0x21a   : > { %927 = vmatmul.mubr.msk.f32.vlgmr.msra.gmra.mrb[2].mxu0 %vm627_vm8, %v620_v59 }
 0x21b   : > { %929 = vmatprep.mubr.msk.f32.mxu0 %vm627_vm8, %v621_v60 }
 0x21e   : > { %930 = vmatmul.mubr.msk.f32.gmra.mrb[4].mxu0 %vm627_vm8, %v622_v61 }
 0x2ed   : > { %v928_v1 = vpop.f32.mrb[2].mxu0 }
 0x2ee   : > { %v712_v2 = vadd.f32 %v928_v1, %v624_v63  ;;  %v706_v3 = vpop.f32.mrb[3].mxu0 }
 0x2ef   : > { %v707_v4 = vadd.f32 %v706_v3, %v623_v0 }
 0x2f0   : > { %v726_v6 = vmax.f32 %v712_v2, 0.0 }
 0x2f1   : > { %v725_v8 = vmax.f32 %v707_v4, 0.0  ;;  %v931_v10 = vpop.f32.mrb[4].mxu0 }
 0x2f2   : > { %v722_v9 = vadd.f32 %v931_v10, %v626_v5  ;;  %v716_v11 = vpop.f32.mrb[5].mxu0 }
 0x2f3   : > { %v957_v12 = vpack.c.bf16 %v726_v6, %v725_v8  ;;  %v717_v13 = vadd.f32 %v716_v11, %v625_v7 }
 0x2f4   : > { %v728_v14 = vmax.f32 %v722_v9, 0.0 }
 0x2f5   : > { %v727_v15 = vmax.f32 %v717_v13, 0.0  ;;  %958 = vmatprep.subr.bf16.mxu1 %v957_v12 }
 0x2f6   : > { %960 = vmatpush3.bf16.msra.mxu1 %v957_v12 }
 0x2f7   : > { %v961_v16 = vpack.c.bf16 %v728_v14, %v727_v15 }
 0x2f9   : > { %962 = vmatprep.subr.bf16.mxu1 %v961_v16 }
 0x2fa   : > { %964 = vmatpush3.bf16.msra.mxu1 %v961_v16 }
 0x2fd   : > { %941 = vmatmul.mubr.msk.f32.vlgmr.msra.gmra.mrb[2].mxu1 %vm614_vm7, %v730_v17 }
 0x3d0   : > { %v942_v20 = vpop.f32.mrb[2].mxu1 }
 0x3d1   : > { %v811_v21 = vadd.f32 %v942_v20, %v732_v18  ;;  %v805_v22 = vpop.f32.mrb[3].mxu1 }
 0x3d2   : > { %v806_v23 = vadd.f32 %v805_v22, %v731_v19 }
 0x3d3   : > { %816 = vst.msk [vmem:[%s278_s27 + $0x8] sm:$0xff] %vm814_vm9, %v811_v21 }
 0x3d4   : > { %815 = vst.msk [vmem:[%s278_s27] sm:$0xff] %vm814_vm9, %v806_v23 }
 0x3d5 PF: > { %s17_s24 = sadd.s32 1, %s1039_s24  }
 0x3d6   : > { %p14_p4 = scmp.ge.s32.totalorder %s17_s24, 4  }
 0x3d8   :  { %16 = sbr.rel (!%p14_p4) target bundleno = 1 (0x1), region = 78 }

</bundles_post_ra>
